<compile_context>
chip_gen: v6e
topology: v6e:2x2x1
jax: 0.10.0
libtpu: 0.0.40
codegen_flags: <defaults>
</compile_context>

<pallas_src>
import math

import jax
import jax.numpy as jnp
from jax.experimental import pallas as pl
from jax.experimental.pallas import tpu as pltpu


def _self_attn_kernel(qkv_ref, w_ref, b_ref, o_ref):
    bb, s, _ = qkv_ref.shape
    d3 = w_ref.shape[-1]          # 3 * d_v
    d_v = d3 // 3

    # --- Fused projections ----------------------------------------------------
    # Leading-dim flatten (2,8,96)->(16,96) is layout-preserving (merges whole
    # sublane tiles), so no relayout is materialized.
    x = qkv_ref[...].reshape(bb * s, qkv_ref.shape[-1])

    # Single MXU pass: (B*S, 3*d_k) @ blockdiag(Wq*scale, Wk, Wv) + [bq*scale|bk|bv].
    proj = jnp.dot(x, w_ref[...], preferred_element_type=jnp.float32) + b_ref[...]

    # Column slices [q'*scale | k' | v'] (within a single 128-lane tile),
    # then split the sublane dim back into (batch, seq) — also layout-preserving.
    qp = proj[:, 0:d_v].reshape(bb, s, d_v)
    kp = proj[:, d_v:2 * d_v].reshape(bb, s, d_v)
    vp = proj[:, 2 * d_v:3 * d_v].reshape(bb, s, d_v)

    # --- Scaled dot-product attention ------------------------------------------
    # Contract on the last dim directly (transposed-RHS matmul, no explicit kp.T).
    scores = jnp.einsum('bqd,bkd->bqk', qp, kp,
                        preferred_element_type=jnp.float32)

    # Numerically stable softmax along the last axis.
    m = jnp.max(scores, axis=-1, keepdims=True)
    e = jnp.exp(scores - m)
    denom = jnp.sum(e, axis=-1, keepdims=True)
    # approx=True (EUP vrcp, ~1e-4 rel err) would miss the 1e-5 tolerance.
    p_attn = e * pl.reciprocal(denom, approx=False)

    out = jnp.einsum('bqk,bkd->bqd', p_attn, vp,
                     preferred_element_type=jnp.float32)

    # 3-D store: block (bb, s, d_v) matches the output layout, no reshape/relayout.
    o_ref[...] = out.astype(o_ref.dtype)


def pack_params(wq, wk, wv, bq, bk, bv):
    """Build call-invariant packed parameters once (off the hot path).

    wX: (d_k, d_v) already in x @ W form (i.e. PyTorch weight transposed);
    bX: (d_v,).  The softmax scale 1/sqrt(d_v) is folded into Wq and bq.
    """
    d_k, d_v = wq.shape
    scale = 1.0 / math.sqrt(d_v)   # PyTorch scales by query.size(-1) == projected d_v
    w = jnp.zeros((3 * d_k, 3 * d_v), dtype=wq.dtype)
    w = w.at[0:d_k, 0:d_v].set(wq * scale)
    w = w.at[d_k:2 * d_k, d_v:2 * d_v].set(wk)
    w = w.at[2 * d_k:3 * d_k, 2 * d_v:3 * d_v].set(wv)
    b = jnp.concatenate([bq * scale, bk, bv]).reshape(1, 3 * d_v)
    return w, b


def self_attention_layer(query, key, value, w_packed, b_packed):
    """query/key/value: (B, S, d_k); w_packed: (3*d_k, 3*d_v); b_packed: (1, 3*d_v)."""
    B, S, d_k = query.shape
    d3 = w_packed.shape[-1]
    d_v = d3 // 3

    # One lane-dense activation operand instead of three 32-lane ones.
    qkv = jnp.concatenate([query, key, value], axis=-1)   # (B, S, 3*d_k)

    return pl.pallas_call(
        _self_attn_kernel,
        out_shape=jax.ShapeDtypeStruct((B, S, d_v), query.dtype),
        grid=(1,),   # whole batch in a single step: kernel is launch/step-bound
        in_specs=[
            pl.BlockSpec((B, S, 3 * d_k), lambda i: (0, 0, 0)),   # packed qkv
            pl.BlockSpec((3 * d_k, d3), lambda i: (0, 0)),        # block-diag W
            pl.BlockSpec((1, d3), lambda i: (0, 0)),              # packed bias
        ],
        out_specs=pl.BlockSpec((B, S, d_v), lambda i: (0, 0, 0)),
        compiler_params=pltpu.CompilerParams(
            dimension_semantics=("arbitrary",),
            # Explicit budget (tiny here); re-derive if B/S are scaled up,
            # especially for v7x's 64 MiB physical VMEM.
            vmem_limit_bytes=32 * 1024 * 1024),
    )(qkv, w_packed, b_packed)


def _reference(query, key, value, wq, wk, wv, bq, bk, bv):
    """Pure-JAX reference matching the PyTorch forward pass."""
    qp = query @ wq + bq
    kp = key @ wk + bk
    vp = value @ wv + bv
    d_v = qp.shape[-1]
    scores = jnp.einsum('bsd,btd->bst', qp, kp) / math.sqrt(d_v)
    p = jax.nn.softmax(scores, axis=-1)
    return jnp.einsum('bst,btd->bsd', p, vp)


if __name__ == "__main__":
    B, S, d_k, d_v = 2, 8, 32, 32

    key0 = jax.random.PRNGKey(0)
    kq, kk, kv, kwq, kwk, kwv, kbq, kbk, kbv = jax.random.split(key0, 9)

    query = jax.random.normal(kq, (B, S, d_k), dtype=jnp.float32)
    keyx  = jax.random.normal(kk, (B, S, d_k), dtype=jnp.float32)
    value = jax.random.normal(kv, (B, S, d_k), dtype=jnp.float32)

    # Deterministic nn.Linear-style init (uniform in [-1/sqrt(d_k), 1/sqrt(d_k)]).
    bound = 1.0 / math.sqrt(d_k)
    wq = jax.random.uniform(kwq, (d_k, d_v), jnp.float32, -bound, bound)
    wk = jax.random.uniform(kwk, (d_k, d_v), jnp.float32, -bound, bound)
    wv = jax.random.uniform(kwv, (d_k, d_v), jnp.float32, -bound, bound)
    bq = jax.random.uniform(kbq, (d_v,), jnp.float32, -bound, bound)
    bk = jax.random.uniform(kbk, (d_v,), jnp.float32, -bound, bound)
    bv = jax.random.uniform(kbv, (d_v,), jnp.float32, -bound, bound)

    # Pack constants once (init-time), not per call.
    w_packed, b_packed = pack_params(wq, wk, wv, bq, bk, bv)

    run = jax.jit(self_attention_layer)
    out = jax.block_until_ready(run(query, keyx, value, w_packed, b_packed))

    ref = _reference(query, keyx, value, wq, wk, wv, bq, bk, bv)
    assert out.shape == (B, S, d_v)
    assert jnp.allclose(out, ref, atol=1e-5, rtol=1e-5), \
        f"max abs err {jnp.max(jnp.abs(out - ref))}"

    print("KERNEL_OK")
</pallas_src>

<mosaic_0001>
module attributes {stable_mosaic.version = 11 : i64} {
  func.func @_self_attn_kernel(%arg0: i32, %arg1: memref<2x8x96xf32, #tpu.memory_space<vmem>>, %arg2: memref<96x96xf32, #tpu.memory_space<vmem>>, %arg3: memref<1x96xf32, #tpu.memory_space<vmem>>, %arg4: memref<2x8x32xf32, #tpu.memory_space<vmem>>) attributes {dimension_semantics = [#tpu.dimension_semantics<arbitrary>], iteration_bounds = array<i64: 1>, scalar_prefetch = 0 : i64, scratch_operands = 0 : i64, tpu.core_type = #tpu.core_type<tc>, window_params = [{pipeline_mode = #tpu.pipeline_mode<synchronous>, transform_indices = @transform_0, window_bounds = array<i64: 2, 8, 96>}, {pipeline_mode = #tpu.pipeline_mode<synchronous>, transform_indices = @transform_1, window_bounds = array<i64: 96, 96>}, {pipeline_mode = #tpu.pipeline_mode<synchronous>, transform_indices = @transform_2, window_bounds = array<i64: 1, 96>}, {pipeline_mode = #tpu.pipeline_mode<synchronous>, transform_indices = @transform_3, window_bounds = array<i64: 2, 8, 32>}]} {
    %c0 = arith.constant 0 : index
    %c0_0 = arith.constant 0 : index
    %c0_1 = arith.constant 0 : index
    %0 = vector.load %arg1[%c0, %c0_0, %c0_1] : memref<2x8x96xf32, #tpu.memory_space<vmem>>, vector<2x8x96xf32>
    %1 = vector.shape_cast %0 : vector<2x8x96xf32> to vector<16x96xf32>
    %c0_2 = arith.constant 0 : index
    %c0_3 = arith.constant 0 : index
    %2 = vector.load %arg2[%c0_2, %c0_3] : memref<96x96xf32, #tpu.memory_space<vmem>>, vector<96x96xf32>
    %cst = arith.constant dense<0.000000e+00> : vector<16x96xf32>
    %3 = tpu.matmul %1, %2, %cst {dimension_numbers = #tpu.dot_dimension_numbers<[1], [0], [0], [1], [0, 0, 1, 1], [], []>} : vector<16x96xf32>, vector<96x96xf32>, vector<16x96xf32> -> vector<16x96xf32>
    %c0_4 = arith.constant 0 : index
    %c0_5 = arith.constant 0 : index
    %4 = vector.load %arg3[%c0_4, %c0_5] : memref<1x96xf32, #tpu.memory_space<vmem>>, vector<1x96xf32>
    %5 = vector.broadcast %4 : vector<1x96xf32> to vector<16x96xf32>
    %6 = arith.addf %3, %5 : vector<16x96xf32>
    %7 = vector.extract_strided_slice %6 {offsets = [0, 0], sizes = [16, 32], strides = [1, 1]} : vector<16x96xf32> to vector<16x32xf32>
    %8 = vector.shape_cast %7 : vector<16x32xf32> to vector<2x8x32xf32>
    %9 = vector.extract_strided_slice %6 {offsets = [0, 32], sizes = [16, 32], strides = [1, 1]} : vector<16x96xf32> to vector<16x32xf32>
    %10 = vector.shape_cast %9 : vector<16x32xf32> to vector<2x8x32xf32>
    %11 = vector.extract_strided_slice %6 {offsets = [0, 64], sizes = [16, 32], strides = [1, 1]} : vector<16x96xf32> to vector<16x32xf32>
    %12 = vector.shape_cast %11 : vector<16x32xf32> to vector<2x8x32xf32>
    "tpu.trace_start"() <{level = 10 : i32, message = "bqd,bkd->bqk"}> : () -> ()
    %cst_6 = arith.constant dense<0.000000e+00> : vector<2x8x8xf32>
    %13 = tpu.matmul %8, %10, %cst_6 {dimension_numbers = #tpu.dot_dimension_numbers<[2], [2], [1], [1], [0, 0, 0, 1, 1, 1], [0], [0]>} : vector<2x8x32xf32>, vector<2x8x32xf32>, vector<2x8x8xf32> -> vector<2x8x8xf32>
    "tpu.trace_stop"() : () -> ()
    %cst_7 = arith.constant dense<0xFF800000> : vector<2x8xf32>
    %14 = vector.multi_reduction <maximumf>, %13, %cst_7 [2] : vector<2x8x8xf32> to vector<2x8xf32>
    %15 = vector.shape_cast %14 : vector<2x8xf32> to vector<2x8x1xf32>
    %16 = vector.broadcast %15 : vector<2x8x1xf32> to vector<2x8x8xf32>
    %17 = arith.subf %13, %16 : vector<2x8x8xf32>
    %18 = math.exp %17 : vector<2x8x8xf32>
    %cst_8 = arith.constant dense<0.000000e+00> : vector<2x8xf32>
    %19 = vector.multi_reduction <add>, %18, %cst_8 [2] : vector<2x8x8xf32> to vector<2x8xf32>
    %20 = vector.shape_cast %19 : vector<2x8xf32> to vector<2x8x1xf32>
    %21 = tpu.reciprocal %20 : vector<2x8x1xf32> -> vector<2x8x1xf32>
    %22 = vector.broadcast %21 : vector<2x8x1xf32> to vector<2x8x8xf32>
    %23 = arith.mulf %18, %22 : vector<2x8x8xf32>
    "tpu.trace_start"() <{level = 10 : i32, message = "bqk,bkd->bqd"}> : () -> ()
    %cst_9 = arith.constant dense<0.000000e+00> : vector<2x8x32xf32>
    %24 = tpu.matmul %23, %12, %cst_9 {dimension_numbers = #tpu.dot_dimension_numbers<[2], [1], [1], [2], [0, 0, 0, 1, 1, 2], [0], [0]>} : vector<2x8x8xf32>, vector<2x8x32xf32>, vector<2x8x32xf32> -> vector<2x8x32xf32>
    "tpu.trace_stop"() : () -> ()
    %c0_10 = arith.constant 0 : index
    %c0_11 = arith.constant 0 : index
    %c0_12 = arith.constant 0 : index
    %25 = vector.load %arg4[%c0_10, %c0_11, %c0_12] : memref<2x8x32xf32, #tpu.memory_space<vmem>>, vector<2x8x32xf32>
    tpu.vector_store %arg4[%c0_10, %c0_11, %c0_12], %24 {strides = array<i32>} : memref<2x8x32xf32, #tpu.memory_space<vmem>>, vector<2x8x32xf32>,
    return
  }
  func.func @transform_0(%arg0: i32) -> (i32, i32, i32) {
    %c0_i32 = arith.constant 0 : i32
    %c0_i32_0 = arith.constant 0 : i32
    %c0_i32_1 = arith.constant 0 : i32
    %c0_i32_2 = arith.constant 0 : i32
    return %c0_i32, %c0_i32_0, %c0_i32_1 : i32, i32, i32
  }
  func.func @transform_1(%arg0: i32) -> (i32, i32) {
    %c0_i32 = arith.constant 0 : i32
    %c0_i32_0 = arith.constant 0 : i32
    %c0_i32_1 = arith.constant 0 : i32
    return %c0_i32, %c0_i32_0 : i32, i32
  }
  func.func @transform_2(%arg0: i32) -> (i32, i32) {
    %c0_i32 = arith.constant 0 : i32
    %c0_i32_0 = arith.constant 0 : i32
    %c0_i32_1 = arith.constant 0 : i32
    return %c0_i32, %c0_i32_0 : i32, i32
  }
  func.func @transform_3(%arg0: i32) -> (i32, i32, i32) {
    %c0_i32 = arith.constant 0 : i32
    %c0_i32_0 = arith.constant 0 : i32
    %c0_i32_1 = arith.constant 0 : i32
    %c0_i32_2 = arith.constant 0 : i32
    return %c0_i32, %c0_i32_0, %c0_i32_1 : i32, i32, i32
  }
}

</mosaic_0001>

<bundles_post_ra>
// kernel: self_attention_layer.1
= control target key start
LH: loop header
LB: loop body
LE: loop exit
PB: predicated region body
PF: predicated region fallthrough
CT: control target
= control target key end

     0   :  { %8 = vsyncpa [#allocation3], 0  ;;  %s686_s0 = inlined_call_operand.vmem [shape: f32[2,8,96], index: 0, kind: input, shape index: {}]   ;;  %s687_s1 = inlined_call_operand.hbm [shape: f32[96,96], index: 1, kind: input, shape index: {}]   ;;  %s688_s2 = inlined_call_operand.vmem [shape: f32[1,96], index: 2, kind: input, shape index: {}]   ;;  %s689_s3 = inlined_call_operand.hbm [shape: f32[2,8,32], index: 3, kind: output, shape index: {}]  }
   0x1   :  { %9 = vsyncpa [#allocation4], 0  ;;  %s619_s12 = smov [#allocation2]  }
   0x2   :  { %s17_s13 = sshll.u32 %s619_s12, 4  ;;  %s18_s13 = int_to_ptr.vmem [resolvable:$true] %s17_s13 }
   0x3   :  { %s583_s14 = scalar_lea.vmem %s18_s13, 1536  ;;  %p588_p1 = scmp.lt.s32.totalorder %s18_s13, %s18_s13 }
   0x4   :  { %p584_p0 = scmp.ne.s32.totalorder %s18_s13, %s583_s14  ;;  %p589_p2 = scmp.lt.s32.totalorder %s583_s14, %s583_s14 }
   0x6   :  { %p590_p3 = por %p589_p2, %p588_p1 }
   0x8   :  { %p591_p4 = pnand %p590_p3, %p584_p0 }
   0xa   :  { %594 = shalt.err (!%p591_p4)
}
   0xb   :  { %s620_s15 = smov 128   ;;  %s621_s16 = smov 8  }
   0xc   :  { %23 = dma.hbm_to_vmem [thread:$0]  %s687_s1, 1536, %s18_s13, [#allocation3], %s620_s15, %s620_s15, %s621_s16  }
   0xd   :  { %615 = dma.done.wait [#allocation3], 1536  }
   0xe   :  { %616 = vsyncadd [#allocation3], 4294965760  ;;  %v42_v0 = vld [vmem:[#allocation2 + $0x58] sm:$0xff]  ;;  %v41_v1 = vld [vmem:[#allocation2 + $0x50] sm:$0xff]  ;;  %vm50_vm0 = vcmask 785408   ;;  %v622_v14 = vmov 0.0  }
   0xf   :  { %512 = vmatprep.subr.mxu0 %v42_v0  ;;  %v40_v2 = vld [vmem:[#allocation2 + $0x48] sm:$0xff]  ;;  %v39_v3 = vld [vmem:[#allocation2 + $0x40] sm:$0xff]  ;;  %v38_v5 = vld [vmem:[#allocation2 + $0x38] sm:$0xff]  ;;  %539 = vmatprep.subr.mxu1 %v622_v14  ;;  %vm623_vm1 = vmmov 0   ;;  %s624_s24 = smov 96   ;;  %vm135_vm2 = vcmask 261120  }
  0x10   :  { %513 = vmatpush3.msra.mxu0 %v42_v0  ;;  %v29_v4 = vld [vmem:[%s686_s0] sm:$0xff]  ;;  %v37_v6 = vld [vmem:[#allocation2 + $0x30] sm:$0xff]  ;;  %v36_v7 = vld [vmem:[#allocation2 + $0x28] sm:$0xff]  ;;  %541 = vmatprep.mubr.msk.f32.mxu1 %vm623_vm1, %v622_v14  ;;  %vm287_vm3 = vcmask 64512  }
  0x11   :  { %514 = vmatprep.subr.mxu0 %v41_v1  ;;  %536 = vmatprep.mubr.msk.f32.mxu0 %vm50_vm0, %v29_v4  ;;  %v35_v8 = vld [vmem:[#allocation2 + $0x20] sm:$0xff]  ;;  %v34_v9 = vld [vmem:[#allocation2 + $0x18] sm:$0xff]  ;;  %v33_v10 = vld [vmem:[#allocation2 + $0x10] sm:$0xff] }
  0x12   :  { %515 = vmatpush3.msra.mxu0 %v41_v1  ;;  %v32_v11 = vld [vmem:[#allocation2 + $0x8] sm:$0xff]  ;;  %v31_v12 = vld [vmem:[#allocation2] sm:$0xff] }
  0x13   :  { %516 = vmatprep.subr.mxu0 %v40_v2  ;;  %v30_v13 = vld [vmem:[%s686_s0 + $0x8] sm:$0xff]  ;;  %v481_v16 = vld [vmem:[%s688_s2] ss:$0 sm:$0xff]  ;;  %s625_s0 = smov 64   ;;  %s626_s2 = smov [#allocation5]  }
  0x14   :  { %517 = vmatpush3.msra.mxu0 %v40_v2  ;;  %s469_s25 = sshll.u32 %s626_s2, 4  ;;  %s470_s25 = int_to_ptr.vmem [resolvable:$true] %s469_s25 }
  0x15   :  { %518 = vmatprep.subr.mxu0 %v39_v3  ;;  %s595_s26 = scalar_lea.vmem %s470_s25, 256  ;;  %p600_p6 = scmp.lt.s32.totalorder %s470_s25, %s470_s25 }
  0x16   :  { %519 = vmatpush3.msra.mxu0 %v39_v3  ;;  %p596_p5 = scmp.ne.s32.totalorder %s470_s25, %s595_s26  ;;  %p601_p7 = scmp.lt.s32.totalorder %s595_s26, %s595_s26 }
  0x17   :  { %520 = vmatprep.subr.mxu0 %v38_v5 }
  0x18   :  { %521 = vmatpush3.msra.mxu0 %v38_v5  ;;  %p602_p8 = por %p601_p7, %p600_p6 }
  0x19   :  { %522 = vmatprep.subr.mxu0 %v37_v6 }
  0x1a   :  { %523 = vmatpush3.msra.mxu0 %v37_v6  ;;  %p603_p9 = pnand %p602_p8, %p596_p5 }
  0x1b   :  { %524 = vmatprep.subr.mxu0 %v36_v7 }
  0x1c   :  { %525 = vmatpush3.msra.mxu0 %v36_v7 }
  0x1d   :  { %526 = vmatprep.subr.mxu0 %v35_v8 }
  0x1e   :  { %527 = vmatpush3.msra.mxu0 %v35_v8 }
  0x1f   :  { %528 = vmatprep.subr.mxu0 %v34_v9 }
  0x20   :  { %529 = vmatpush3.msra.mxu0 %v34_v9 }
  0x21   :  { %530 = vmatprep.subr.mxu0 %v33_v10 }
  0x22   :  { %531 = vmatpush3.msra.mxu0 %v33_v10 }
  0x23   :  { %532 = vmatprep.subr.mxu0 %v32_v11 }
  0x24   :  { %533 = vmatpush3.msra.mxu0 %v32_v11 }
  0x25   :  { %534 = vmatprep.subr.mxu0 %v31_v12 }
  0x26   :  { %535 = vmatpush3.msra.mxu0 %v31_v12 }
  0x27   :  { %537 = vmatmul.mubr.msk.f32.vlgmr.msra.gmra.mxu0 %vm50_vm0, %v30_v13 }
  0xe7   :  { %v538_v15 = vpop.f32.mrf.mxu0 }
  0xe8   :  { %v129_v19 = vadd.f32 %v538_v15, %v481_v16 }
  0xe9   :  { %v123_v17 = vpop.f32.mrf.mxu0 }
  0xea   :  { %v124_v18 = vadd.f32 %v481_v16, %v123_v17 }
  0xec   :  { %133 = vrot.lane.b32.xlu0 %v124_v18, %s624_s24 }
  0xf0   :  { %211 = vrot.lane.b32.xlu0 %v129_v19, %s624_s24 }
 0x15e   :  { %v134_v20 = vpop.permute.xlu0 %133 }
 0x15f   :  { %540 = vmatpush3.xpose.msk.msra.mxu1 %vm135_vm2, %v134_v20 }
 0x160   :  { %544 = vmatprep.subr.mxu1 %v622_v14 }
 0x162   :  { %542 = vmatmul.mubr.msk.f32.vlgmr.msra.gmra.mxu1 %vm135_vm2, %v124_v18  ;;  %v212_v21 = vpop.permute.xlu0 %211 }
 0x163   :  { %545 = vmatpush3.xpose.msk.msra.mxu1 %vm135_vm2, %v212_v21  ;;  %546 = vmatprep.mubr.msk.f32.mxu1 %vm623_vm1, %v622_v14 }
 0x164   :  { %549 = vmatprep.subr.mxu1 %v622_v14 }
 0x166   :  { %547 = vmatmul.mubr.msk.f32.vlgmr.msra.gmra.mxu1 %vm135_vm2, %v129_v19 }
 0x167   :  { %551 = vmatprep.mubr.msk.f32.mxu1 %vm623_vm1, %v622_v14 }
 0x222   :  { %v206_v22 = vpop.f32.mrf.mxu1 }
 0x223   :  { %v288_v23 = vsel %vm287_vm3, %v206_v22, -inf }
 0x224   :  { %289 = vmax.xlane.f32.xlu1 %v288_v23  ;;  %v543_v24 = vpop.f32.mrf.mxu1 }
 0x226   :  { %v283_v25 = vpop.f32.mrf.mxu1 }
 0x227   :  { %v291_v26 = vsel %vm287_vm3, %v283_v25, -inf }
 0x228   :  { %292 = vmax.xlane.f32.xlu1 %v291_v26  ;;  %v548_v27 = vpop.f32.mrf.mxu1 }
 0x239   :  { %310 = vrot.lane.b32.xlu1 %v124_v18, %s625_s0 }
 0x2ad   :  { %v290_v28 = vpop.xlane.xlu1 %289 }
 0x2ae   :  { %v294_v29 = vsub.f32 %v206_v22, %v290_v28 }
 0x2b0   :  { %v296_v30 = vmul.f32 1.442695, %v294_v29 }
 0x2b1   :  { %v293_v31 = vpop.xlane.xlu1 %292 }
 0x2b2   :  { %567 = vpow2.f32 %v296_v30  ;;  %v295_v32 = vsub.f32 %v283_v25, %v293_v31 }
 0x2b4   :  { %v298_v33 = vmul.f32 1.442695, %v295_v32 }
 0x2b5   :  { %v311_v34 = vpop.permute.xlu1 %310 }
 0x2b6   :  { %569 = vpow2.f32 %v298_v33  ;;  %550 = vmatpush3.msra.mxu1 %v311_v34 }
 0x2b7   :  { %554 = vmatprep.subr.mxu1 %v622_v14 }
 0x2bf   :  { %v568_v35 = vpop.eup %567 }
 0x2c0   :  { %v300_v36 = vsel %vm287_vm3, %v568_v35, 0.0 }
 0x2c1   :  { %301 = vadd.xlane.f32.xlu0 %v300_v36 }
 0x2c3   :  { %v570_v37 = vpop.eup %569 }
 0x2c4   :  { %v303_v38 = vsel %vm287_vm3, %v570_v37, 0.0 }
 0x2c5   :  { %304 = vadd.xlane.f32.xlu1 %v303_v38 }
 0x2d6   :  { %386 = vrot.lane.b32.xlu1 %v129_v19, %s625_s0 }
 0x34a   :  { %v302_v39 = vpop.xlane.xlu0 %301 }
 0x34b   :  { %571 = vrcp.f32 %v302_v39 }
 0x34e   :  { %v305_v40 = vpop.xlane.xlu1 %304 }
 0x34f   :  { %573 = vrcp.f32 %v305_v40 }
 0x352   :  { %v387_v43 = vpop.permute.xlu1 %386 }
 0x358   :  { %v572_v41 = vpop.eup %571 }
 0x359   :  { %v308_v42 = vmul.f32 %v572_v41, %v568_v35 }
 0x35b   :  { %552 = vmatmul.mubr.msk.f32.vlgmr.msra.gmra.mxu1 %vm287_vm3, %v308_v42 }
 0x35c   :  { %v574_v44 = vpop.eup %573  ;;  %555 = vmatpush3.msra.mxu1 %v387_v43  ;;  %556 = vmatprep.mubr.msk.f32.mxu1 %vm623_vm1, %v622_v14 }
 0x35d   :  { %v309_v45 = vmul.f32 %v574_v44, %v570_v37 }
 0x35f   :  { %557 = vmatmul.mubr.msk.f32.vlgmr.msra.gmra.mxu1 %vm287_vm3, %v309_v45 }
 0x41b   :  { %v382_v46 = vpop.f32.mrf.mxu1 }
 0x41c   :  { %462 = vst.msk [vmem:[#allocation5] sm:$0xff] %vm135_vm2, %v382_v46 }
 0x41d   :  { %v553_v47 = vpop.f32.mrf.mxu1 }
 0x41f   :  { %v458_v48 = vpop.f32.mrf.mxu1 }
 0x420   :  { %463 = vst.msk [vmem:[#allocation5 + $0x8] sm:$0xff] %vm135_vm2, %v458_v48 }
 0x421   :  { %v558_v49 = vpop.f32.mrf.mxu1 }
 0x422   :  { %606 = shalt.err (!%p603_p9)
}
 0x423   :  { %475 = dma.vmem_to_hbm [thread:$0]  %s470_s25, 256, %s689_s3, [#allocation4], %s620_s15, %s620_s15, %s621_s16  }
 0x424   :  { %617 = dma.done.wait [#allocation4], 256  }
 0x425   :  { %618 = vsyncadd [#allocation4], 4294967040 }
 0x426   :  { %479 = vsyncpa [#allocation3], 1 }
 0x427   :  { %480 = vsyncpa [#allocation4], 1 }

</bundles_post_ra>
